<compile_context>
chip_gen: v6e
topology: v6e:2x2x1
jax: 0.10.0
libtpu: 0.0.40
codegen_flags: <defaults>
</compile_context>

<pallas_src>
import math
import functools

import jax
import jax.numpy as jnp
from jax import lax
from jax.experimental import pallas as pl
from jax.experimental.pallas import tpu as pltpu

_MIB = 1024 * 1024


def _round_up(x, m):
    return ((x + m - 1) // m) * m


def _round_down_pow2(x):
    return 1 << (max(1, int(x)).bit_length() - 1)


def _pick_block(n, tb_target):
    """Block size: multiple of 8, clamped to the (padded) input, >= ~4 blocks
    on large inputs so v7x's two TensorCores both get work."""
    tb = max(8, (int(tb_target) // 8) * 8)
    tb = min(tb, _round_up(n, 8))
    tb = min(tb, max(256, _round_up(-(-n // 4), 8)))
    return max(8, tb)


# ---------------------------------------------------------------------------
# Path 1: VMEM-resident table, one-hot @ table on the MXU (small vocab).
# ---------------------------------------------------------------------------
def _onehot_kernel(tok_ref, emb_ref, out_ref, *, scale):
    """tok_ref: (tb, 1) int32 VMEM; emb_ref: (vocab, emb_p) f32 VMEM resident;
    out_ref: (tb, emb_p) f32 VMEM."""
    tb = out_ref.shape[0]
    vocab = emb_ref.shape[0]
    ids = tok_ref[...]                                            # (tb, 1)
    cols = lax.broadcasted_iota(jnp.int32, (tb, vocab), 1)        # (tb, vocab)
    onehot = (ids == cols).astype(jnp.float32)
    out_ref[...] = jnp.dot(onehot, emb_ref[...],
                           preferred_element_type=jnp.float32) * scale


def _embed_onehot(tok_flat, emb_table_p, *, scale, tb):
    n = tok_flat.shape[0]
    vocab, emb_p = emb_table_p.shape
    n_pad = _round_up(n, tb)
    if n_pad != n:
        tok_flat = jnp.pad(tok_flat, (0, n_pad - n))
    num_blocks = n_pad // tb
    ids2d = tok_flat.reshape(n_pad, 1)

    cost = pl.CostEstimate(
        flops=2 * n_pad * vocab * emb_p,
        transcendentals=0,
        bytes_accessed=n_pad * emb_p * 4 + vocab * emb_p * 4 + n_pad * 4,
    )

    out = pl.pallas_call(
        functools.partial(_onehot_kernel, scale=scale),
        out_shape=jax.ShapeDtypeStruct((n_pad, emb_p), jnp.float32),
        grid_spec=pltpu.PrefetchScalarGridSpec(
            num_scalar_prefetch=0,
            grid=(num_blocks,),
            in_specs=[
                pl.BlockSpec((tb, 1), lambda i: (i, 0)),            # ids tile
                pl.BlockSpec((vocab, emb_p), lambda i: (0, 0)),      # resident table
            ],
            out_specs=pl.BlockSpec((tb, emb_p), lambda i: (i, 0)),
        ),
        compiler_params=pltpu.CompilerParams(
            dimension_semantics=("parallel",),
            vmem_limit_bytes=40 * _MIB,
        ),
        cost_estimate=cost,
    )(ids2d, emb_table_p)
    return out[:n]


# ---------------------------------------------------------------------------
# Path 2: HBM table, manual DMA row-gather straight into the output tile.
# ---------------------------------------------------------------------------
def _gather_kernel(tok_ref, emb_hbm, out_ref, sems, *, scale, token_block, window):
    """tok_ref : SMEM (n_pad,) int32     -- scalar-prefetched token ids
    emb_hbm : HBM  (vocab, emb_p) f32    -- full table, never copied wholesale
    out_ref : VMEM (token_block, emb_p)  -- rows are DMA'd directly here
    sems    : DMA semaphores, shape (window,)"""
    i = pl.program_id(0)
    base = pl.multiple_of(i * token_block, token_block)

    def make_copy(r, tok):
        # Real descriptor (same src row + same dst slice) used for both start
        # and wait, so the semaphore byte counts always match exactly.
        return pltpu.make_async_copy(
            emb_hbm.at[pl.ds(tok, 1), :],
            out_ref.at[pl.ds(r, 1), :],
            sems.at[r % window],
        )

    def tok_at(r):
        return tok_ref[base + r]

    # Prime the in-flight DMA window (window is a small static int).
    for r in range(window):
        make_copy(r, tok_at(r)).start()

    # Steady state: read the NEXT id before the wait (keeps the SMEM scalar
    # load off the semaphore-wait critical path), retire row r, then reuse the
    # freed semaphore slot for row r + window.  Moderate unroll gives the LLO
    # scheduler room to overlap descriptor issue with waits.
    if token_block > window:
        def steady(r, carry):
            nxt_tok = tok_at(r + window)
            cur_tok = tok_at(r)
            make_copy(r, cur_tok).wait()
            make_copy(r + window, nxt_tok).start()
            return carry
        lax.fori_loop(0, token_block - window, steady, 0, unroll=8)

    # Drain the tail of the window.
    for r in range(token_block - window, token_block):
        make_copy(r, tok_at(r)).wait()

    # Scale in place: rows already live in the output tile.
    out_ref[...] = out_ref[...] * scale


def _embed_gather_chunk(tok_flat, emb_table_p, *, scale, tb, window):
    n = tok_flat.shape[0]
    vocab, emb_p = emb_table_p.shape
    n_pad = _round_up(n, tb)
    if n_pad != n:
        # Padded rows gather row 0 and are sliced off below.
        tok_flat = jnp.pad(tok_flat, (0, n_pad - n))
    num_blocks = n_pad // tb
    win = _round_down_pow2(min(window, tb))

    # Pure copy+scale: bytes dominate (rows in + output out + ids).
    cost = pl.CostEstimate(
        flops=n_pad * emb_p,
        transcendentals=0,
        bytes_accessed=2 * n_pad * emb_p * 4 + n_pad * 4,
    )

    out = pl.pallas_call(
        functools.partial(_gather_kernel, scale=scale, token_block=tb, window=win),
        out_shape=jax.ShapeDtypeStruct((n_pad, emb_p), jnp.float32),
        grid_spec=pltpu.PrefetchScalarGridSpec(
            num_scalar_prefetch=1,                          # token ids -> SMEM
            grid=(num_blocks,),
            in_specs=[pl.BlockSpec(memory_space=pl.ANY)],   # table stays in HBM
            out_specs=pl.BlockSpec((tb, emb_p), lambda i, tok: (i, 0)),
            scratch_shapes=[pltpu.SemaphoreType.DMA((win,))],
        ),
        compiler_params=pltpu.CompilerParams(
            dimension_semantics=("parallel",),
            vmem_limit_bytes=40 * _MIB,
        ),
        cost_estimate=cost,
    )(tok_flat, emb_table_p)
    return out[:n]


# ---------------------------------------------------------------------------
# Public wrapper.
# ---------------------------------------------------------------------------
def token_embedding(tokens, emb_table, *, token_block=2048, window=128):
    """tokens: (seq, batch) int; emb_table: (vocab, emb) f32 -> (seq, batch, emb) f32."""
    seq, batch = tokens.shape
    vocab, emb = emb_table.shape
    n = seq * batch
    scale = float(math.sqrt(emb))

    # Lane-dense output tiles: pad emb to a multiple of 128 (no copy when
    # already aligned, which is the common case).
    emb_p = _round_up(max(emb, 128), 128)
    table_p = emb_table if emb_p == emb else jnp.pad(
        emb_table, ((0, 0), (0, emb_p - emb)))

    # nn.Embedding raises on out-of-range ids; we clamp so the gather stays in
    # bounds (semantics differ only on invalid inputs).
    tok_flat = jnp.clip(tokens.reshape(n).astype(jnp.int32), 0, vocab - 1)

    table_bytes = vocab * emb_p * 4
    use_onehot = (vocab <= 1024) and (table_bytes <= 4 * _MIB)

    if use_onehot:
        # Block bounded by the one-hot intermediate and the double-buffered
        # output tile; vocab <= 1024 keeps the MXU work trivial.
        tb = min(token_block,
                 (4 * _MIB) // (4 * vocab),
                 (4 * _MIB) // (4 * emb_p))
        tb = _pick_block(n, tb)
        out_flat = _embed_onehot(tok_flat, table_p, scale=scale, tb=tb)
    else:
        # Output double-buffer budget ~12 MiB keeps large blocks viable under
        # v7x's 64 MiB VMEM and v5e's scoped default without spilling.
        tb = min(token_block, (12 * _MIB) // (2 * 4 * emb_p))
        tb = _pick_block(n, tb)
        # Chunk very long token streams across pallas_calls so the SMEM
        # scalar-prefetch id array stays small (<= ~128 KiB after pow2 padding).
        chunk = max(tb, (32768 // tb) * tb)
        if n <= chunk:
            out_flat = _embed_gather_chunk(tok_flat, table_p, scale=scale,
                                           tb=tb, window=window)
        else:
            pieces = []
            for s in range(0, n, chunk):
                pieces.append(_embed_gather_chunk(
                    tok_flat[s:s + chunk], table_p,
                    scale=scale, tb=tb, window=window))
            out_flat = jnp.concatenate(pieces, axis=0)

    if emb_p != emb:
        out_flat = out_flat[:, :emb]
    return out_flat.reshape(seq, batch, emb)


if __name__ == "__main__":
    key = jax.random.PRNGKey(0)
    k1, k2, k3, k4 = jax.random.split(key, 4)

    # --- Module-default-ish config: small vocab -> VMEM-resident MXU path ---
    vocab_size, emb_size, seq, batch = 32, 128, 8, 2
    emb_table = jax.random.normal(k1, (vocab_size, emb_size), dtype=jnp.float32)
    tokens = jax.random.randint(k2, (seq, batch), 0, vocab_size, dtype=jnp.int32)

    out = jax.block_until_ready(token_embedding(tokens, emb_table))
    ref = emb_table[tokens] * math.sqrt(emb_size)
    assert out.shape == (seq, batch, emb_size)
    assert jnp.allclose(out, ref, atol=1e-5, rtol=1e-5)

    # --- Larger vocab: HBM table + manual DMA row-gather path ---
    vocab2, emb2, seq2, batch2 = 4096, 128, 64, 4
    emb_table2 = jax.random.normal(k3, (vocab2, emb2), dtype=jnp.float32)
    tokens2 = jax.random.randint(k4, (seq2, batch2), 0, vocab2, dtype=jnp.int32)

    out2 = jax.block_until_ready(token_embedding(tokens2, emb_table2))
    ref2 = emb_table2[tokens2] * math.sqrt(emb2)
    assert out2.shape == (seq2, batch2, emb2)
    assert jnp.allclose(out2, ref2, atol=1e-5, rtol=1e-5)

    print("KERNEL_OK")
</pallas_src>

<mosaic_0001>
module attributes {stable_mosaic.version = 11 : i64} {
  func.func @_onehot_kernel(%arg0: i32, %arg1: memref<16x1xi32, #tpu.memory_space<vmem>>, %arg2: memref<32x128xf32, #tpu.memory_space<vmem>>, %arg3: memref<16x128xf32, #tpu.memory_space<vmem>>) attributes {dimension_semantics = [#tpu.dimension_semantics<parallel>], iteration_bounds = array<i64: 1>, scalar_prefetch = 0 : i64, scratch_operands = 0 : i64, tpu.core_type = #tpu.core_type<tc>, window_params = [{transform_indices = @transform_0, window_bounds = array<i64: 16, 1>}, {pipeline_mode = #tpu.pipeline_mode<synchronous>, transform_indices = @transform_1, window_bounds = array<i64: 32, 128>}, {transform_indices = @transform_2, window_bounds = array<i64: 16, 128>}]} {
    %c0 = arith.constant 0 : index
    %c0_0 = arith.constant 0 : index
    %0 = vector.load %arg1[%c0, %c0_0] : memref<16x1xi32, #tpu.memory_space<vmem>>, vector<16x1xi32>
    %1 = tpu.iota {dimensions = array<i32: 1>} : vector<16x32xi32>
    %2 = vector.broadcast %0 : vector<16x1xi32> to vector<16x32xi32>
    %3 = arith.cmpi eq, %2, %1 : vector<16x32xi32>
    %4 = arith.extui %3 : vector<16x32xi1> to vector<16x32xi32>
    %5 = arith.sitofp %4 : vector<16x32xi32> to vector<16x32xf32>
    %c0_1 = arith.constant 0 : index
    %c0_2 = arith.constant 0 : index
    %6 = vector.load %arg2[%c0_1, %c0_2] : memref<32x128xf32, #tpu.memory_space<vmem>>, vector<32x128xf32>
    %cst = arith.constant dense<0.000000e+00> : vector<16x128xf32>
    %7 = tpu.matmul %5, %6, %cst {dimension_numbers = #tpu.dot_dimension_numbers<[1], [0], [0], [1], [0, 0, 1, 1], [], []>} : vector<16x32xf32>, vector<32x128xf32>, vector<16x128xf32> -> vector<16x128xf32>
    %cst_3 = arith.constant 11.3137083 : f32
    %8 = vector.broadcast %cst_3 : f32 to vector<16x128xf32>
    %9 = arith.mulf %7, %8 : vector<16x128xf32>
    %c0_4 = arith.constant 0 : index
    %c0_5 = arith.constant 0 : index
    %10 = vector.load %arg3[%c0_4, %c0_5] : memref<16x128xf32, #tpu.memory_space<vmem>>, vector<16x128xf32>
    tpu.vector_store %arg3[%c0_4, %c0_5], %9 {strides = array<i32>} : memref<16x128xf32, #tpu.memory_space<vmem>>, vector<16x128xf32>,
    return
  }
  func.func @transform_0(%arg0: i32) -> (i32, i32) {
    %c0_i32 = arith.constant 0 : i32
    %c0_i32_0 = arith.constant 0 : i32
    return %arg0, %c0_i32 : i32, i32
  }
  func.func @transform_1(%arg0: i32) -> (i32, i32) {
    %c0_i32 = arith.constant 0 : i32
    %c0_i32_0 = arith.constant 0 : i32
    %c0_i32_1 = arith.constant 0 : i32
    return %c0_i32, %c0_i32_0 : i32, i32
  }
  func.func @transform_2(%arg0: i32) -> (i32, i32) {
    %c0_i32 = arith.constant 0 : i32
    %c0_i32_0 = arith.constant 0 : i32
    return %arg0, %c0_i32 : i32, i32
  }
}

</mosaic_0001>

<bundles_post_ra>
// kernel: tpu_custom_call.1
= control target key start
LH: loop header
LB: loop body
LE: loop exit
PB: predicated region body
PF: predicated region fallthrough
CT: control target
= control target key end

     0   :  { %7 = vsyncpa [#allocation3], 0  ;;  %s260_s0 = inlined_call_operand.vmem [shape: s32[16,1], index: 0, kind: input, shape index: {}]   ;;  %s261_s1 = inlined_call_operand.hbm [shape: f32[32,128], index: 1, kind: input, shape index: {}]   ;;  %s262_s2 = inlined_call_operand.hbm [shape: f32[16,128], index: 2, kind: output, shape index: {}]  }
   0x1   :  { %8 = vsyncpa [#allocation4], 0  ;;  %s221_s9 = smov [#allocation2]  }
   0x2   :  { %s16_s10 = sshll.u32 %s221_s9, 4  ;;  %s17_s10 = int_to_ptr.vmem [resolvable:$true] %s16_s10 }
   0x3   :  { %s185_s11 = scalar_lea.vmem %s17_s10, 512  ;;  %p190_p1 = scmp.lt.s32.totalorder %s17_s10, %s17_s10 }
   0x4   :  { %p186_p0 = scmp.ne.s32.totalorder %s17_s10, %s185_s11  ;;  %p191_p2 = scmp.lt.s32.totalorder %s185_s11, %s185_s11 }
   0x6   :  { %p192_p3 = por %p191_p2, %p190_p1 }
   0x8   :  { %p193_p4 = pnand %p192_p3, %p186_p0 }
   0xa   :  { %196 = shalt.err (!%p193_p4)
}
   0xb   :  { %s222_s12 = smov 128   ;;  %s223_s13 = smov 8  }
   0xc   :  { %22 = dma.hbm_to_vmem [thread:$0]  %s261_s1, 512, %s17_s10, [#allocation3], %s222_s12, %s222_s12, %s223_s13  }
   0xd   :  { %217 = dma.done.wait [#allocation3], 512  }
   0xe   :  { %218 = vsyncadd [#allocation3], 4294966784  ;;  %v224_v0 = vmov 0   ;;  %v26_v1 = vld [vmem:[%s260_s0] sm:$0xff]  ;;  %v45_v2 = vld [vmem:[#allocation2 + $0x18] sm:$0xff]  ;;  %v28_v7 = vlaneseq  ;;  %vm46_vm0 = vcmask 261120  }
   0xf   :  { %176 = vset.pattern.permute.xlu0 %v224_v0  ;;  %159 = vmatprep.subr.mxu0 %v45_v2  ;;  %v44_v3 = vld [vmem:[#allocation2 + $0x10] sm:$0xff]  ;;  %v27_v4 = vld [vmem:[%s260_s0 + $0x8] sm:$0xff]  ;;  %v42_v6 = vld [vmem:[#allocation2] sm:$0xff]  ;;  %v225_v10 = vmov 0.0   ;;  %s226_s0 = smov [#allocation5]  }
  0x10   :  { %31 = vperm.xlu0 %176, %v26_v1   ;;  %160 = vmatpush3.msra.mxu0 %v45_v2  ;;  %v43_v5 = vld [vmem:[#allocation2 + $0x8] sm:$0xff]  ;;  %v29_v8 = vand.u32 127, %v28_v7  ;;  %s137_s1 = sshll.u32 %s226_s0, 4  ;;  %s138_s1 = int_to_ptr.vmem [resolvable:$true] %s137_s1 }
  0x11   :  { %161 = vmatprep.subr.mxu0 %v44_v3  ;;  %s197_s20 = scalar_lea.vmem %s138_s1, 256  ;;  %p202_p6 = scmp.lt.s32.totalorder %s138_s1, %s138_s1 }
  0x12   :  { %162 = vmatpush3.msra.mxu0 %v44_v3  ;;  %p198_p5 = scmp.ne.s32.totalorder %s138_s1, %s197_s20  ;;  %p203_p7 = scmp.lt.s32.totalorder %s197_s20, %s197_s20 }
  0x13   :  { %163 = vmatprep.subr.mxu0 %v43_v5 }
  0x14   :  { %34 = vperm.xlu0 %176, %v27_v4   ;;  %164 = vmatpush3.msra.mxu0 %v43_v5  ;;  %p204_p8 = por %p203_p7, %p202_p6 }
  0x15   :  { %165 = vmatprep.subr.mxu0 %v42_v6 }
  0x16   :  { %166 = vmatpush3.msra.mxu0 %v42_v6  ;;  %p205_p9 = pnand %p204_p8, %p198_p5 }
  0x8b   :  { %v32_v9 = vpop.permute.xlu0 %31 }
  0x8c   :  { %vm36_vm1 = vcmp.eq.s32.totalorder %v32_v9, %v29_v8 }
  0x8d   :  { %v149_v11 = vsel %vm36_vm1, 1.0, %v225_v10 }
  0x8e   :  { %167 = vmatprep.mubr.msk.f32.mxu0 %vm46_vm0, %v149_v11 }
  0x8f   :  { %v35_v12 = vpop.permute.xlu0 %34 }
  0x90   :  { %vm37_vm2 = vcmp.eq.s32.totalorder %v35_v12, %v29_v8 }
  0x91   :  { %v150_v13 = vsel %vm37_vm2, 1.0, %v225_v10 }
  0x92   :  { %168 = vmatmul.mubr.msk.f32.vlgmr.msra.gmra.mxu0 %vm46_vm0, %v150_v13 }
 0x152   :  { %v169_v14 = vpop.f32.mrf.mxu0 }
 0x153   :  { %v129_v15 = vmul.f32 11.313708, %v169_v14 }
 0x154   :  { %v119_v16 = vpop.f32.mrf.mxu0 }
 0x155   :  { %131 = vst [vmem:[#allocation5 + $0x8] sm:$0xff] %v129_v15  ;;  %v128_v17 = vmul.f32 11.313708, %v119_v16 }
 0x157   :  { %130 = vst [vmem:[#allocation5] sm:$0xff] %v128_v17 }
 0x158   :  { %208 = shalt.err (!%p205_p9)
}
 0x159   :  { %143 = dma.vmem_to_hbm [thread:$0]  %s138_s1, 256, %s262_s2, [#allocation4], %s222_s12, %s222_s12, %s223_s13  }
 0x15a   :  { %219 = dma.done.wait [#allocation4], 256  }
 0x15b   :  { %220 = vsyncadd [#allocation4], 4294967040 }
 0x15c   :  { %147 = vsyncpa [#allocation3], 1 }
 0x15d   :  { %148 = vsyncpa [#allocation4], 1 }

</bundles_post_ra>
